<compile_context>
chip_gen: v6e
topology: v6e:2x2x1
jax: 0.10.0
libtpu: 0.0.40
codegen_flags: <defaults>
</compile_context>

<pallas_src>
import functools

import jax
import jax.numpy as jnp
from jax.experimental import pallas as pl
from jax.experimental.pallas import tpu as pltpu


def _round_up(x, m):
    return ((x + m - 1) // m) * m


def decoder_kernel(x_ref, w1_ref, b1_ref, w2_ref, b2_ref, o_ref, h_acc):
    """Grid = (batch_tiles, k1_tiles). k1 streams the fc1 contraction dim."""
    k = pl.program_id(1)

    @pl.when(k == 0)
    def _():
        h_acc[...] = jnp.zeros_like(h_acc)

    # fc1 partial product for this K tile (MXU, f32 accumulate).
    h_acc[...] += jnp.dot(x_ref[...], w1_ref[...],
                          preferred_element_type=jnp.float32)

    @pl.when(k == pl.num_programs(1) - 1)
    def _():
        # Finalize fc1: bias + ReLU, then fused fc2 on the resident h tile.
        h = jnp.maximum(h_acc[...] + b1_ref[...].astype(jnp.float32), 0.0)
        y = jnp.dot(h.astype(w2_ref.dtype), w2_ref[...],
                    preferred_element_type=jnp.float32)
        o_ref[...] = (y + b2_ref[...].astype(jnp.float32)).astype(o_ref.dtype)


@functools.partial(jax.jit, static_argnames=("tm", "tk"))
def decoder_forward(x, w1, b1, w2, b2, *, tm=256, tk=512):
    """x: (B, input_dims); w1: (input_dims, out_dims); b1: (out_dims,) or (1, out_dims);
       w2: (out_dims, out_dims); b2: (out_dims,) or (1, out_dims)."""
    B, Din = x.shape
    H = w1.shape[1]
    dt = x.dtype

    # --- lane/sublane-dense padding -------------------------------------
    sub = 16 if dt == jnp.bfloat16 else 8          # sublane multiple per dtype
    Bp = _round_up(B, sub)
    TM = min(tm, Bp)
    Bp = _round_up(Bp, TM)

    Dinp = _round_up(Din, 128)
    TK = min(tk, Dinp)
    Dinp = _round_up(Dinp, TK)

    Hp = _round_up(H, 128)

    xp = jnp.zeros((Bp, Dinp), dt).at[:B, :Din].set(x)
    w1p = jnp.zeros((Dinp, Hp), w1.dtype).at[:Din, :H].set(w1)
    b1p = jnp.zeros((1, Hp), b1.dtype).at[:, :H].set(jnp.reshape(b1, (1, H)))
    w2p = jnp.zeros((Hp, Hp), w2.dtype).at[:H, :H].set(w2)
    b2p = jnp.zeros((1, Hp), b2.dtype).at[:, :H].set(jnp.reshape(b2, (1, H)))

    grid = (Bp // TM, Dinp // TK)

    itemsize = jnp.dtype(dt).itemsize
    cost = pl.CostEstimate(
        flops=2 * B * (Din * H + H * H),
        transcendentals=0,
        bytes_accessed=(x.size + w1.size + w2.size + 2 * H) * itemsize
        + B * H * itemsize,
    )

    out_p = pl.pallas_call(
        decoder_kernel,
        out_shape=jax.ShapeDtypeStruct((Bp, Hp), dt),
        grid_spec=pltpu.PrefetchScalarGridSpec(
            num_scalar_prefetch=0,
            grid=grid,
            in_specs=[
                pl.BlockSpec((TM, TK), lambda m, k: (m, k)),     # x tile
                pl.BlockSpec((TK, Hp), lambda m, k: (k, 0)),     # W1 K-slab
                pl.BlockSpec((1, Hp), lambda m, k: (0, 0)),      # b1 (resident)
                pl.BlockSpec((Hp, Hp), lambda m, k: (0, 0)),     # W2 (resident)
                pl.BlockSpec((1, Hp), lambda m, k: (0, 0)),      # b2 (resident)
            ],
            out_specs=pl.BlockSpec((TM, Hp), lambda m, k: (m, 0)),
            scratch_shapes=[pltpu.VMEM((TM, Hp), jnp.float32)],  # h accumulator
        ),
        compiler_params=pltpu.CompilerParams(
            dimension_semantics=("parallel", "arbitrary")),
        cost_estimate=cost,
    )(xp, w1p, b1p, w2p, b2p)

    # Slice padding back off (padded columns hold only padded-zero bias).
    return out_p[:B, :H]


def init_params(key, input_dims, out_dims, dtype=jnp.float32):
    """Synthetic init mirroring nn.Linear fan-in scaling.

    PyTorch stores weight as (out, in); here weights are (in, out) so the
    kernel computes x @ W without a transpose.  Biases kept 2D (1, out).
    """
    k1, k2, k3, k4 = jax.random.split(key, 4)
    bound1 = 1.0 / jnp.sqrt(input_dims)
    bound2 = 1.0 / jnp.sqrt(out_dims)
    w1 = jax.random.uniform(k1, (input_dims, out_dims), dtype, -bound1, bound1)
    b1 = jax.random.uniform(k2, (1, out_dims), dtype, -bound1, bound1)
    w2 = jax.random.uniform(k3, (out_dims, out_dims), dtype, -bound2, bound2)
    b2 = jax.random.uniform(k4, (1, out_dims), dtype, -bound2, bound2)
    return w1, b1, w2, b2


def decoder_reference(x, w1, b1, w2, b2):
    h = jnp.maximum(jnp.dot(x, w1, preferred_element_type=jnp.float32) + b1, 0.0)
    return jnp.dot(h, w2, preferred_element_type=jnp.float32) + b2


if __name__ == "__main__":
    key = jax.random.PRNGKey(0)
    kx, kp = jax.random.split(key)

    batch = 8
    input_dims = 32
    out_dims = 32

    x = jax.random.normal(kx, (batch, input_dims), jnp.float32)
    w1, b1, w2, b2 = init_params(kp, input_dims, out_dims)

    out = decoder_forward(x, w1, b1, w2, b2)
    out = jax.block_until_ready(out)

    ref = decoder_reference(x, w1, b1, w2, b2)
    assert out.shape == (batch, out_dims)
    assert jnp.allclose(out, ref, atol=1e-5, rtol=1e-5)

    print("KERNEL_OK")
</pallas_src>

<mosaic_0001>
module attributes {stable_mosaic.version = 11 : i64} {
  func.func @decoder_kernel(%arg0: i32, %arg1: i32, %arg2: memref<8x128xf32, #tpu.memory_space<vmem>>, %arg3: memref<128x128xf32, #tpu.memory_space<vmem>>, %arg4: memref<1x128xf32, #tpu.memory_space<vmem>>, %arg5: memref<128x128xf32, #tpu.memory_space<vmem>>, %arg6: memref<1x128xf32, #tpu.memory_space<vmem>>, %arg7: memref<8x128xf32, #tpu.memory_space<vmem>>, %arg8: memref<8x128xf32, #tpu.memory_space<vmem>>) attributes {dimension_semantics = [#tpu.dimension_semantics<parallel>, #tpu.dimension_semantics<arbitrary>], iteration_bounds = array<i64: 1, 1>, scalar_prefetch = 0 : i64, scratch_operands = 1 : i64, tpu.core_type = #tpu.core_type<tc>, window_params = [{transform_indices = @transform_0, window_bounds = array<i64: 8, 128>}, {transform_indices = @transform_1, window_bounds = array<i64: 128, 128>}, {pipeline_mode = #tpu.pipeline_mode<synchronous>, transform_indices = @transform_2, window_bounds = array<i64: 1, 128>}, {pipeline_mode = #tpu.pipeline_mode<synchronous>, transform_indices = @transform_3, window_bounds = array<i64: 128, 128>}, {pipeline_mode = #tpu.pipeline_mode<synchronous>, transform_indices = @transform_4, window_bounds = array<i64: 1, 128>}, {transform_indices = @transform_5, window_bounds = array<i64: 8, 128>}]} {
    %c0_i32 = arith.constant 0 : i32
    %0 = arith.cmpi eq, %arg1, %c0_i32 : i32
    %1 = arith.extui %0 : i1 to i32
    %c0_i32_0 = arith.constant 0 : i32
    %2 = arith.cmpi ne, %1, %c0_i32_0 : i32
    scf.if %2 {
      %cst_10 = arith.constant 0.000000e+00 : f32
      %12 = vector.broadcast %cst_10 : f32 to vector<8x128xf32>
      %c0_11 = arith.constant 0 : index
      %c0_12 = arith.constant 0 : index
      %13 = vector.load %arg8[%c0_11, %c0_12] : memref<8x128xf32, #tpu.memory_space<vmem>>, vector<8x128xf32>
      tpu.vector_store %arg8[%c0_11, %c0_12], %12 {strides = array<i32>} : memref<8x128xf32, #tpu.memory_space<vmem>>, vector<8x128xf32>,
    } else {
    }
    %c0 = arith.constant 0 : index
    %c0_1 = arith.constant 0 : index
    %3 = vector.load %arg8[%c0, %c0_1] : memref<8x128xf32, #tpu.memory_space<vmem>>, vector<8x128xf32>
    %c0_2 = arith.constant 0 : index
    %c0_3 = arith.constant 0 : index
    %4 = vector.load %arg2[%c0_2, %c0_3] : memref<8x128xf32, #tpu.memory_space<vmem>>, vector<8x128xf32>
    %c0_4 = arith.constant 0 : index
    %c0_5 = arith.constant 0 : index
    %5 = vector.load %arg3[%c0_4, %c0_5] : memref<128x128xf32, #tpu.memory_space<vmem>>, vector<128x128xf32>
    %cst = arith.constant dense<0.000000e+00> : vector<8x128xf32>
    %6 = tpu.matmul %4, %5, %cst {dimension_numbers = #tpu.dot_dimension_numbers<[1], [0], [0], [1], [0, 0, 1, 1], [], []>} : vector<8x128xf32>, vector<128x128xf32>, vector<8x128xf32> -> vector<8x128xf32>
    %7 = arith.addf %3, %6 : vector<8x128xf32>
    %c0_6 = arith.constant 0 : index
    %c0_7 = arith.constant 0 : index
    %8 = vector.load %arg8[%c0_6, %c0_7] : memref<8x128xf32, #tpu.memory_space<vmem>>, vector<8x128xf32>
    tpu.vector_store %arg8[%c0_6, %c0_7], %7 {strides = array<i32>} : memref<8x128xf32, #tpu.memory_space<vmem>>, vector<8x128xf32>,
    %c0_i32_8 = arith.constant 0 : i32
    %9 = arith.cmpi eq, %arg1, %c0_i32_8 : i32
    %10 = arith.extui %9 : i1 to i32
    %c0_i32_9 = arith.constant 0 : i32
    %11 = arith.cmpi ne, %10, %c0_i32_9 : i32
    scf.if %11 {
      %c0_10 = arith.constant 0 : index
      %c0_11 = arith.constant 0 : index
      %12 = vector.load %arg8[%c0_10, %c0_11] : memref<8x128xf32, #tpu.memory_space<vmem>>, vector<8x128xf32>
      %c0_12 = arith.constant 0 : index
      %c0_13 = arith.constant 0 : index
      %13 = vector.load %arg4[%c0_12, %c0_13] : memref<1x128xf32, #tpu.memory_space<vmem>>, vector<1x128xf32>
      %14 = vector.broadcast %13 : vector<1x128xf32> to vector<8x128xf32>
      %15 = arith.addf %12, %14 : vector<8x128xf32>
      %cst_14 = arith.constant 0.000000e+00 : f32
      %16 = vector.broadcast %cst_14 : f32 to vector<8x128xf32>
      %17 = arith.maximumf %15, %16 : vector<8x128xf32>
      %c0_15 = arith.constant 0 : index
      %c0_16 = arith.constant 0 : index
      %18 = vector.load %arg5[%c0_15, %c0_16] : memref<128x128xf32, #tpu.memory_space<vmem>>, vector<128x128xf32>
      %cst_17 = arith.constant dense<0.000000e+00> : vector<8x128xf32>
      %19 = tpu.matmul %17, %18, %cst_17 {dimension_numbers = #tpu.dot_dimension_numbers<[1], [0], [0], [1], [0, 0, 1, 1], [], []>} : vector<8x128xf32>, vector<128x128xf32>, vector<8x128xf32> -> vector<8x128xf32>
      %c0_18 = arith.constant 0 : index
      %c0_19 = arith.constant 0 : index
      %20 = vector.load %arg6[%c0_18, %c0_19] : memref<1x128xf32, #tpu.memory_space<vmem>>, vector<1x128xf32>
      %21 = vector.broadcast %20 : vector<1x128xf32> to vector<8x128xf32>
      %22 = arith.addf %19, %21 : vector<8x128xf32>
      %c0_20 = arith.constant 0 : index
      %c0_21 = arith.constant 0 : index
      %23 = vector.load %arg7[%c0_20, %c0_21] : memref<8x128xf32, #tpu.memory_space<vmem>>, vector<8x128xf32>
      tpu.vector_store %arg7[%c0_20, %c0_21], %22 {strides = array<i32>} : memref<8x128xf32, #tpu.memory_space<vmem>>, vector<8x128xf32>,
    } else {
    }
    return
  }
  func.func @transform_0(%arg0: i32, %arg1: i32) -> (i32, i32) {
    %c0_i32 = arith.constant 0 : i32
    return %arg0, %arg1 : i32, i32
  }
  func.func @transform_1(%arg0: i32, %arg1: i32) -> (i32, i32) {
    %c0_i32 = arith.constant 0 : i32
    %c0_i32_0 = arith.constant 0 : i32
    return %arg1, %c0_i32 : i32, i32
  }
  func.func @transform_2(%arg0: i32, %arg1: i32) -> (i32, i32) {
    %c0_i32 = arith.constant 0 : i32
    %c0_i32_0 = arith.constant 0 : i32
    %c0_i32_1 = arith.constant 0 : i32
    return %c0_i32, %c0_i32_0 : i32, i32
  }
  func.func @transform_3(%arg0: i32, %arg1: i32) -> (i32, i32) {
    %c0_i32 = arith.constant 0 : i32
    %c0_i32_0 = arith.constant 0 : i32
    %c0_i32_1 = arith.constant 0 : i32
    return %c0_i32, %c0_i32_0 : i32, i32
  }
  func.func @transform_4(%arg0: i32, %arg1: i32) -> (i32, i32) {
    %c0_i32 = arith.constant 0 : i32
    %c0_i32_0 = arith.constant 0 : i32
    %c0_i32_1 = arith.constant 0 : i32
    return %c0_i32, %c0_i32_0 : i32, i32
  }
  func.func @transform_5(%arg0: i32, %arg1: i32) -> (i32, i32) {
    %c0_i32 = arith.constant 0 : i32
    %c0_i32_0 = arith.constant 0 : i32
    return %arg0, %c0_i32 : i32, i32
  }
}

</mosaic_0001>

<bundles_post_ra>
// kernel: decoder_forward.1
= control target key start
LH: loop header
LB: loop body
LE: loop exit
PB: predicated region body
PF: predicated region fallthrough
CT: control target
= control target key end

     0   :  { %v368_v1 = vmov 0.0   ;;  %vm369_vm0 = vmmov 0   ;;  %s543_s0 = inlined_call_operand.vmem [shape: f32[8,128], index: 0, kind: input, shape index: {}]   ;;  %s544_s1 = inlined_call_operand.vmem [shape: f32[128,128], index: 1, kind: input, shape index: {}]   ;;  %s545_s2 = inlined_call_operand.vmem [shape: f32[1,128], index: 2, kind: input, shape index: {}]   ;;  %s546_s3 = inlined_call_operand.vmem [shape: f32[128,128], index: 3, kind: input, shape index: {}]   ;;  %s547_s4 = inlined_call_operand.vmem [shape: f32[1,128], index: 4, kind: input, shape index: {}]   ;;  %s548_s5 = inlined_call_operand.hbm [shape: f32[8,128], index: 5, kind: output, shape index: {}]  }
   0x1   :  { %v43_v0 = vld [vmem:[%s544_s1 + $0x78] sm:$0xff]  ;;  %273 = vmatprep.subr.mxu0 %v368_v1  ;;  %v42_v2 = vld [vmem:[%s544_s1 + $0x70] sm:$0xff]  ;;  %305 = vmatprep.mubr.msk.f32.mxu0 %vm369_vm0, %v368_v1  ;;  %v41_v3 = vld [vmem:[%s544_s1 + $0x68] sm:$0xff] }
   0x2   :  { %274 = vmatpush3.msra.mxu0 %v43_v0  ;;  %308 = vmatprep.subr.mxu1 %v368_v1  ;;  %v40_v4 = vld [vmem:[%s544_s1 + $0x60] sm:$0xff]  ;;  %v144_v5 = vld [vmem:[%s546_s3 + $0x78] sm:$0xff]  ;;  %v143_v6 = vld [vmem:[%s546_s3 + $0x70] sm:$0xff] }
   0x3   :  { %275 = vmatprep.subr.mxu0 %v368_v1  ;;  %340 = vmatprep.mubr.msk.f32.mxu1 %vm369_vm0, %v368_v1  ;;  %v39_v7 = vld [vmem:[%s544_s1 + $0x58] sm:$0xff]  ;;  %v142_v8 = vld [vmem:[%s546_s3 + $0x68] sm:$0xff]  ;;  %v38_v9 = vld [vmem:[%s544_s1 + $0x50] sm:$0xff] }
   0x4   :  { %276 = vmatpush3.msra.mxu0 %v42_v2  ;;  %309 = vmatpush3.msra.mxu1 %v144_v5  ;;  %v141_v10 = vld [vmem:[%s546_s3 + $0x60] sm:$0xff] }
   0x5   :  { %277 = vmatprep.subr.mxu0 %v368_v1  ;;  %310 = vmatprep.subr.mxu1 %v368_v1 }
   0x6   :  { %278 = vmatpush3.msra.mxu0 %v41_v3  ;;  %311 = vmatpush3.msra.mxu1 %v143_v6 }
   0x7   :  { %279 = vmatprep.subr.mxu0 %v368_v1  ;;  %312 = vmatprep.subr.mxu1 %v368_v1 }
   0x8   :  { %280 = vmatpush3.msra.mxu0 %v40_v4  ;;  %313 = vmatpush3.msra.mxu1 %v142_v8 }
   0x9   :  { %281 = vmatprep.subr.mxu0 %v368_v1 }
   0xa   :  { %282 = vmatpush3.msra.mxu0 %v39_v7 }
   0xb   :  { %10 = vsyncpa [#allocation4], 0  ;;  %283 = vmatprep.subr.mxu0 %v368_v1  ;;  %v37_v11 = vld [vmem:[%s544_s1 + $0x48] sm:$0xff]  ;;  %314 = vmatprep.subr.mxu1 %v368_v1  ;;  %v140_v12 = vld [vmem:[%s546_s3 + $0x58] sm:$0xff]  ;;  %s370_s11 = smov [#allocation3]  }
   0xc   :  { %284 = vmatpush3.msra.mxu0 %v38_v9  ;;  %315 = vmatpush3.msra.mxu1 %v141_v10  ;;  %v36_v13 = vld [vmem:[%s544_s1 + $0x40] sm:$0xff]  ;;  %v139_v14 = vld [vmem:[%s546_s3 + $0x50] sm:$0xff]  ;;  %v35_v15 = vld [vmem:[%s544_s1 + $0x38] sm:$0xff]  ;;  %s229_s12 = sshll.u32 %s370_s11, 4  ;;  %s230_s12 = int_to_ptr.vmem [resolvable:$true] %s229_s12 }
   0xd   :  { %285 = vmatprep.subr.mxu0 %v368_v1  ;;  %316 = vmatprep.subr.mxu1 %v368_v1  ;;  %v138_v16 = vld [vmem:[%s546_s3 + $0x48] sm:$0xff]  ;;  %v34_v17 = vld [vmem:[%s544_s1 + $0x30] sm:$0xff]  ;;  %v137_v18 = vld [vmem:[%s546_s3 + $0x40] sm:$0xff]  ;;  %p351_p1 = scmp.lt.s32.totalorder %s230_s12, %s230_s12 }
   0xe   :  { %286 = vmatpush3.msra.mxu0 %v37_v11  ;;  %317 = vmatpush3.msra.mxu1 %v140_v12  ;;  %v33_v19 = vld [vmem:[%s544_s1 + $0x28] sm:$0xff]  ;;  %v136_v20 = vld [vmem:[%s546_s3 + $0x38] sm:$0xff]  ;;  %v32_v21 = vld [vmem:[%s544_s1 + $0x20] sm:$0xff] }
   0xf   :  { %287 = vmatprep.subr.mxu0 %v368_v1  ;;  %318 = vmatprep.subr.mxu1 %v368_v1  ;;  %v135_v22 = vld [vmem:[%s546_s3 + $0x30] sm:$0xff]  ;;  %v31_v23 = vld [vmem:[%s544_s1 + $0x18] sm:$0xff]  ;;  %v134_v24 = vld [vmem:[%s546_s3 + $0x28] sm:$0xff] }
  0x10   :  { %288 = vmatpush3.msra.mxu0 %v36_v13  ;;  %319 = vmatpush3.msra.mxu1 %v139_v14  ;;  %v30_v25 = vld [vmem:[%s544_s1 + $0x10] sm:$0xff]  ;;  %v133_v26 = vld [vmem:[%s546_s3 + $0x20] sm:$0xff]  ;;  %v29_v27 = vld [vmem:[%s544_s1 + $0x8] sm:$0xff] }
  0x11   :  { %289 = vmatprep.subr.mxu0 %v368_v1  ;;  %320 = vmatprep.subr.mxu1 %v368_v1  ;;  %v132_v28 = vld [vmem:[%s546_s3 + $0x18] sm:$0xff]  ;;  %v28_v29 = vld [vmem:[%s544_s1] sm:$0xff]  ;;  %v131_v31 = vld [vmem:[%s546_s3 + $0x10] sm:$0xff] }
  0x12   :  { %290 = vmatpush3.msra.mxu0 %v35_v15  ;;  %321 = vmatpush3.msra.mxu1 %v138_v16  ;;  %v27_v30 = vld [vmem:[%s543_s0] sm:$0xff]  ;;  %v130_v32 = vld [vmem:[%s546_s3 + $0x8] sm:$0xff] }
  0x13   :  { %291 = vmatprep.subr.mxu0 %v368_v1  ;;  %322 = vmatprep.subr.mxu1 %v368_v1  ;;  %v129_v33 = vld [vmem:[%s546_s3] sm:$0xff]  ;;  %s346_s3 = scalar_lea.vmem %s230_s12, 128 }
  0x14   :  { %292 = vmatpush3.msra.mxu0 %v34_v17  ;;  %323 = vmatpush3.msra.mxu1 %v137_v18  ;;  %v237_v34 = vld [vmem:[%s545_s2] ss:$0 sm:$0xff]  ;;  %p347_p0 = scmp.ne.s32.totalorder %s230_s12, %s346_s3  ;;  %p352_p2 = scmp.lt.s32.totalorder %s346_s3, %s346_s3 }
  0x15   :  { %293 = vmatprep.subr.mxu0 %v368_v1  ;;  %324 = vmatprep.subr.mxu1 %v368_v1  ;;  %v238_v39 = vld [vmem:[%s547_s4] ss:$0 sm:$0xff] }
  0x16   :  { %294 = vmatpush3.msra.mxu0 %v33_v19  ;;  %325 = vmatpush3.msra.mxu1 %v136_v20  ;;  %p353_p3 = por %p352_p2, %p351_p1 }
  0x17   :  { %295 = vmatprep.subr.mxu0 %v368_v1  ;;  %326 = vmatprep.subr.mxu1 %v368_v1 }
  0x18   :  { %296 = vmatpush3.msra.mxu0 %v32_v21  ;;  %327 = vmatpush3.msra.mxu1 %v135_v22  ;;  %p354_p4 = pnand %p353_p3, %p347_p0 }
  0x19   :  { %297 = vmatprep.subr.mxu0 %v368_v1  ;;  %328 = vmatprep.subr.mxu1 %v368_v1 }
  0x1a   :  { %298 = vmatpush3.msra.mxu0 %v31_v23  ;;  %329 = vmatpush3.msra.mxu1 %v134_v24 }
  0x1b   :  { %299 = vmatprep.subr.mxu0 %v368_v1  ;;  %330 = vmatprep.subr.mxu1 %v368_v1 }
  0x1c   :  { %300 = vmatpush3.msra.mxu0 %v30_v25  ;;  %331 = vmatpush3.msra.mxu1 %v133_v26 }
  0x1d   :  { %301 = vmatprep.subr.mxu0 %v368_v1  ;;  %332 = vmatprep.subr.mxu1 %v368_v1 }
  0x1e   :  { %302 = vmatpush3.msra.mxu0 %v29_v27  ;;  %333 = vmatpush3.msra.mxu1 %v132_v28 }
  0x1f   :  { %303 = vmatprep.subr.mxu0 %v368_v1  ;;  %334 = vmatprep.subr.mxu1 %v368_v1 }
  0x20   :  { %304 = vmatpush3.msra.mxu0 %v28_v29  ;;  %335 = vmatpush3.msra.mxu1 %v131_v31 }
  0x21   :  { %306 = vmatmul.mubr.f32.vlgmr.msra.gmra.mxu0 %v27_v30  ;;  %336 = vmatprep.subr.mxu1 %v368_v1 }
  0x22   :  { %337 = vmatpush3.msra.mxu1 %v130_v32 }
  0x23   :  { %338 = vmatprep.subr.mxu1 %v368_v1 }
  0x24   :  { %339 = vmatpush3.msra.mxu1 %v129_v33 }
  0xe1   :  { %v110_v35 = vpop.f32.mrf.mxu0 }
  0xe2   :  { %v127_v36 = vadd.f32 %v237_v34, %v110_v35 }
  0xe3   :  { %v307_v37 = vpop.f32.mrf.mxu0 }
  0xe4   :  { %v128_v38 = vmax.f32 %v127_v36, 0.0 }
  0xe6   :  { %341 = vmatmul.mubr.f32.vlgmr.msra.gmra.mxu1 %v128_v38 }
 0x1a6   :  { %v218_v40 = vpop.f32.mrf.mxu1 }
 0x1a7   :  { %v219_v41 = vadd.f32 %v238_v39, %v218_v40 }
 0x1a8   :  { %v342_v42 = vpop.f32.mrf.mxu1 }
 0x1a9   :  { %222 = vst [vmem:[#allocation3] sm:$0xff] %v219_v41 }
 0x1aa   :  { %357 = shalt.err (!%p354_p4)
}
 0x1ab   :  { %232 = dma.vmem_to_hbm [thread:$0]  %s230_s12, 128, %s548_s5, [#allocation4]  }
 0x1ac   :  { %366 = dma.done.wait [#allocation4], 128  }
 0x1ad   :  { %367 = vsyncadd [#allocation4], 4294967168 }
 0x1ae   :  { %236 = vsyncpa [#allocation4], 1 }

</bundles_post_ra>
